<compile_context>
chip_gen: v6e
topology: v6e:2x2x1
jax: 0.10.0
libtpu: 0.0.40
codegen_flags: <defaults>
</compile_context>

<pallas_src>
import math
import numpy as np
import jax
import jax.numpy as jnp
from jax.experimental import pallas as pl
from jax.experimental.pallas import tpu as pltpu

# ----------------------------- hyper-params ----------------------------------
L = 8                                   # hop size
MODEL_DIM = 32                          # model_dim (n_filters of gammatone bank)
LABEL_LEN = 16
OUT_BUF_LEN = 2
SAMPLE_RATE = 16000
LOOKAHEAD = True
KERNEL_SIZE = 3 * L if LOOKAHEAD else L
N_CHUNKS = KERNEL_SIZE // L             # analysis taps per hop (3)
FREQ_BIN = SAMPLE_RATE // MODEL_DIM
EMB_HID = 512
CIN = MODEL_DIM + MODEL_DIM // 2        # channels into LN/BN (48)
KD = (OUT_BUF_LEN + 1) * L              # synthesis kernel length (24)
T_TILE = 1024                           # time tile for the fused kernel


# ----------------------------- Pallas kernels --------------------------------
def _encoder_kernel(xr_ref, w_ref, o_ref):
    """Gammatone analysis conv (stride=L, K=N_CHUNKS*L) + ReLU, lane-dense out.

    xr_ref: [1, L, Tc]        hop-reshaped audio (f32), Tc = Tq + N_CHUNKS - 1
    w_ref : [N_CHUNKS, C, L]  bf16 filter taps per hop-chunk
    o_ref : [1, C, Tq]        f32, time on lanes
    """
    C, tq = o_ref.shape[1], o_ref.shape[2]
    xb = xr_ref[0].astype(jnp.bfloat16)                       # [L, Tc]
    acc = jnp.zeros((C, tq), jnp.float32)
    for j in range(w_ref.shape[0]):                           # 3 shifted matmuls
        acc = acc + jnp.dot(w_ref[j], xb[:, j:j + tq],
                            preferred_element_type=jnp.float32)
    o_ref[0] = jnp.maximum(acc, 0.0)


def _fused_gn_bn_dec_kernel(ss_ref, enc_ref, pidx_ref, w_enc_ref, w_oh_ref,
                            bnb_ref, decw_ref, o_ref):
    """GroupNorm(1)-apply + 1x1 conv (BN) + (identity) mask + synthesis matmul.

    ss_ref   : [1, CIN, 2]  f32 per-batch folded GN scale|shift (gamma*rstd, ...)
    enc_ref  : [1, C, t]    f32 encoder features, time on lanes
    pidx_ref : [1, 1, t]    int32 pitch bin indices
    w_enc_ref: [C, C]       bf16 BN weights for the encoder channels
    w_oh_ref : [C, C//2]    bf16 BN weights for the one-hot pitch channels
    bnb_ref  : [C, 1]       f32 BN bias
    decw_ref : [KD, C]      bf16 transposed ConvTranspose1d weight
    o_ref    : [1, KD, t]   f32 per-frame synthesis output, time on lanes
    """
    C = w_enc_ref.shape[1]
    Ch = w_oh_ref.shape[1]
    t = enc_ref.shape[2]

    ss = ss_ref[0]                                            # [CIN, 2]
    scale, shift = ss[:, 0:1], ss[:, 1:2]                     # [CIN, 1]

    # GroupNorm(1) apply (stats folded in scale/shift), encoder channels.
    xn = enc_ref[0] * scale[:C] + shift[:C]                   # [C, t] f32

    # One-hot pitch channels, built in-register (never touch HBM), then GN.
    ch = jax.lax.broadcasted_iota(jnp.int32, (Ch, t), 0)
    oh = (ch == pidx_ref[0]).astype(jnp.float32)              # [Ch, t]
    ohn = oh * scale[C:] + shift[C:]

    # BN: 1x1 conv over the 48 concatenated channels, split as two matmuls.
    y = (jnp.dot(w_enc_ref[...], xn.astype(jnp.bfloat16),
                 preferred_element_type=jnp.float32)
         + jnp.dot(w_oh_ref[...], ohn.astype(jnp.bfloat16),
                   preferred_element_type=jnp.float32)
         + bnb_ref[...])
    # TODO(synk): MaskNet (self.mask_gen) source is not provided; identity mask.
    ym = y

    # Decoder synthesis matmul (ConvTranspose1d weights), time stays on lanes.
    o_ref[0] = jnp.dot(decw_ref[...], ym.astype(jnp.bfloat16),
                       preferred_element_type=jnp.float32)


# ----------------------------- Pallas wrappers -------------------------------
def encoder_pallas(xr, w3):
    """xr: [B, L, Tc] f32 hop-reshaped audio; w3: [N_CHUNKS, C, L] bf16."""
    B, Lh, Tc = xr.shape
    C = w3.shape[1]
    Tq = Tc - (w3.shape[0] - 1)
    # NOTE: full-time block per batch.  Budget ~40 B/sample with double
    # buffering -> fine up to ~minutes of 16 kHz audio; T-tile if longer.
    return pl.pallas_call(
        _encoder_kernel,
        out_shape=jax.ShapeDtypeStruct((B, C, Tq), jnp.float32),
        grid=(B,),
        in_specs=[
            pl.BlockSpec((1, Lh, Tc), lambda b: (b, 0, 0)),
            pl.BlockSpec(w3.shape, lambda b: (0, 0, 0)),
        ],
        out_specs=pl.BlockSpec((1, C, Tq), lambda b: (b, 0, 0)),
        compiler_params=pltpu.CompilerParams(dimension_semantics=("parallel",)),
    )(xr, w3)


def fused_gn_bn_dec_pallas(norm_ss, enc, pidx, w_enc, w_oh, bn_b, dec_wt,
                           t_tile):
    B, C, Tpad = enc.shape
    n_t = Tpad // t_tile
    kd = dec_wt.shape[0]
    return pl.pallas_call(
        _fused_gn_bn_dec_kernel,
        out_shape=jax.ShapeDtypeStruct((B, kd, Tpad), jnp.float32),
        grid=(B, n_t),
        in_specs=[
            pl.BlockSpec((1, CIN, 2), lambda b, t: (b, 0, 0)),      # GN scale|shift
            pl.BlockSpec((1, C, t_tile), lambda b, t: (b, 0, t)),   # enc features
            pl.BlockSpec((1, 1, t_tile), lambda b, t: (b, 0, t)),   # pitch bins
            pl.BlockSpec(w_enc.shape, lambda b, t: (0, 0)),         # resident weights
            pl.BlockSpec(w_oh.shape, lambda b, t: (0, 0)),
            pl.BlockSpec(bn_b.shape, lambda b, t: (0, 0)),
            pl.BlockSpec(dec_wt.shape, lambda b, t: (0, 0)),
        ],
        out_specs=pl.BlockSpec((1, kd, t_tile), lambda b, t: (b, 0, t)),
        compiler_params=pltpu.CompilerParams(
            dimension_semantics=("parallel", "arbitrary")),
    )(norm_ss, enc, pidx, w_enc, w_oh, bn_b, dec_wt)


# ----------------------------- Param_GTFB (parameter setup glue) -------------
def _freq_hz_2_erb(f):
    return 9.265 * np.log(1.0 + f / (24.7 * 9.265))


def _erb_2_freq_hz(e):
    return (np.exp(e / 9.265) - 1.0) * 24.7 * 9.265


def make_gtfb_params(n_filters, kernel_size, sample_rate):
    t = np.arange(1.0, kernel_size + 1, dtype=np.float32).reshape(1, -1) / sample_rate
    low_hz = 50.0
    high_hz = sample_rate / 2 - (50 + 50)
    erb_f = np.linspace(_freq_hz_2_erb(low_hz), _freq_hz_2_erb(high_hz),
                        n_filters, dtype="float32")
    hz = _erb_2_freq_hz(erb_f).astype(np.float32)
    erb = 24.7 + 0.108 * hz
    p_int = 4
    divisor = (np.pi * math.factorial(2 * p_int - 2)
               * np.power(2.0, float(-(2 * p_int - 2)))
               / np.square(math.factorial(p_int - 1)))
    b = (erb / divisor).astype(np.float32)
    return dict(
        t=jnp.asarray(t),
        p=jnp.full((1, 1), 4.0, jnp.float32),
        fc=jnp.asarray(hz).reshape(-1, 1),
        b=jnp.asarray(b).reshape(-1, 1),
        phi=jnp.zeros((n_filters, 1), jnp.float32),
    )


def gtfb_filters(gp):
    # Param_GTFB.filters(): synthesize the gammatone analysis filters [C, K]
    eps = 1e-6
    t, p, fc, b, phi = gp["t"], gp["p"], gp["fc"], gp["b"], gp["phi"]
    phi_comp = -fc * (p - 1.0) / (b + eps)
    A = ((4.0 * np.pi * b) ** ((2.0 * p + 1.0) / 2.0)
         / jnp.sqrt(jnp.exp(jax.scipy.special.gammaln(2.0 * p + 1.0)))
         * np.sqrt(2.0))
    gtone = (t ** (p - 1.0)) * jnp.exp(-2.0 * np.pi * b * t) * \
        jnp.cos(2.0 * np.pi * fc * t + phi_comp + phi)
    gtone = A * gtone
    norm = 1.0 / jnp.sqrt(jnp.mean(gtone ** 2, axis=1, keepdims=True))
    return gtone * norm                                       # [n_filters, K]


# ----------------------------- plain-XLA helpers ------------------------------
def _layernorm(h, g, b, eps=1e-5):
    mu = jnp.mean(h, axis=-1, keepdims=True)
    var = jnp.mean(jnp.square(h - mu), axis=-1, keepdims=True)
    return (h - mu) * jax.lax.rsqrt(var + eps) * g + b


def _label_embedding(label, emb):
    # Linear -> LayerNorm -> ReLU -> Linear -> LayerNorm -> ReLU (tiny; XLA).
    h = jnp.maximum(_layernorm(label @ emb["w1"] + emb["b1"],
                               emb["g1"], emb["be1"]), 0.0)
    h = jnp.maximum(_layernorm(h @ emb["w2"] + emb["b2"],
                               emb["g2"], emb["be2"]), 0.0)
    return h


# ----------------------------- parameter init ---------------------------------
def init_params(key):
    keys = jax.random.split(key, 4)
    C = MODEL_DIM
    emb = dict(
        w1=jax.random.normal(keys[1], (LABEL_LEN, EMB_HID), jnp.float32) / np.sqrt(LABEL_LEN),
        b1=jnp.zeros((1, EMB_HID), jnp.float32),
        g1=jnp.ones((1, EMB_HID), jnp.float32),
        be1=jnp.zeros((1, EMB_HID), jnp.float32),
        w2=jax.random.normal(keys[2], (EMB_HID, C), jnp.float32) / np.sqrt(EMB_HID),
        b2=jnp.zeros((1, C), jnp.float32),
        g2=jnp.ones((1, C), jnp.float32),
        be2=jnp.zeros((1, C), jnp.float32),
    )
    return dict(
        gt_enc=make_gtfb_params(C, KERNEL_SIZE, SAMPLE_RATE),
        ln_gamma=jnp.ones((CIN,), jnp.float32),
        ln_beta=jnp.zeros((CIN,), jnp.float32),
        bn_w=jax.random.normal(keys[0], (C, CIN), jnp.float32) / np.sqrt(CIN),
        bn_b=jnp.zeros((C,), jnp.float32),
        emb=emb,
        dec_w=jax.random.normal(keys[3], (C, KD), jnp.float32) / np.sqrt(C),
    )


# ----------------------------- Net.forward ------------------------------------
def net_forward(params, mixture, label, pitch_info):
    B = mixture.shape[0]
    C = MODEL_DIM

    # --- mod_pad: lookahead pad (L, L), then pad to multiple of L -------------
    pad_size = (L, L) if LOOKAHEAD else (0, 0)
    x = jnp.pad(mixture, ((0, 0), (0, 0), pad_size))
    mod = (L - x.shape[-1] % L) % L
    if mod:
        x = jnp.pad(x, ((0, 0), (0, 0), (0, mod)))
    Tp = x.shape[-1]
    Tc = Tp // L
    Tq = Tc - (N_CHUNKS - 1)                    # number of analysis frames

    # --- in_conv: gammatone Encoder (stride-L conv, no frame duplication) -----
    filt = gtfb_filters(params["gt_enc"])                                 # [C, K]
    w3 = filt.reshape(C, N_CHUNKS, L).transpose(1, 0, 2).astype(jnp.bfloat16)
    xr = x[:, 0, :].reshape(B, Tc, L).transpose(0, 2, 1)                  # [B, L, Tc]
    enc = encoder_pallas(xr, w3)                                          # [B, C, Tq]

    # --- pitch bins: linear interpolation to Tq, floor-div to bin index -------
    # TODO(synk): jax.image.resize('linear') edge handling may differ slightly
    # from F.interpolate(mode='linear', align_corners=False).
    pitch_i = jax.image.resize(pitch_info, (B, Tq), method="linear")
    p_idx = jnp.clip(jnp.floor(pitch_i / FREQ_BIN).astype(jnp.int32),
                     0, C // 2 - 1)[:, None, :]                           # [B, 1, Tq]

    # --- GroupNorm(1) statistics (exact, f32 stats pass) -----------------------
    # The one-hot pitch block has exactly one 1.0 per frame, so its exact
    # contribution to both sum and sum-of-squares is Tq.
    n_el = CIN * Tq
    s1 = jnp.sum(enc, axis=(1, 2)) + Tq
    s2 = jnp.sum(jnp.square(enc), axis=(1, 2)) + Tq
    mu = s1 / n_el
    var = s2 / n_el - mu * mu
    rstd = jax.lax.rsqrt(var + 1e-8)            # eps matches nn.GroupNorm(eps=1e-08)
    gamma = params["ln_gamma"][None, :, None]                            # [1, CIN, 1]
    beta = params["ln_beta"][None, :, None]
    scale = gamma * rstd[:, None, None]                                  # [B, CIN, 1]
    shift = beta - mu[:, None, None] * scale
    norm_ss = jnp.concatenate([scale, shift], axis=-1)                   # [B, CIN, 2]

    # --- label embedding (plain XLA; conditions mask_gen in the original) -----
    l_emb = _label_embedding(label, params["emb"])                       # [B, C]
    del l_emb  # TODO(synk): consumed by MaskNet (mask_gen), source not provided.

    # --- fused GN-apply + BN(1x1 conv) + mask + ConvTranspose matmul -----------
    if Tq > T_TILE:
        t_tile = T_TILE
        Tpad = ((Tq + T_TILE - 1) // T_TILE) * T_TILE
    else:
        t_tile, Tpad = Tq, Tq
    enc_p = enc if Tpad == Tq else jnp.pad(enc, ((0, 0), (0, 0), (0, Tpad - Tq)))
    pid_p = p_idx if Tpad == Tq else jnp.pad(p_idx, ((0, 0), (0, 0), (0, Tpad - Tq)))

    w_enc = params["bn_w"][:, :C].astype(jnp.bfloat16)                   # [C, C]
    w_oh = params["bn_w"][:, C:].astype(jnp.bfloat16)                    # [C, C//2]
    bn_b = params["bn_b"][:, None]                                       # [C, 1]
    dec_wt = params["dec_w"].T.astype(jnp.bfloat16)                      # [KD, C]

    fr = fused_gn_bn_dec_pallas(norm_ss, enc_p, pid_p, w_enc, w_oh,
                                bn_b, dec_wt, t_tile)[:, :, :Tq]         # [B, KD, Tq]

    # --- ConvTranspose1d overlap-add as a shifted sum (no scatter) -------------
    # The prepended zero out_buf frames and padding=OUT_BUF_LEN*L cancel exactly:
    # real frame t contributes its KD samples starting at output sample t*L.
    oa = fr[:, 0:L, :]
    for j in range(1, KD // L):
        oa = oa + jnp.pad(fr[:, j * L:(j + 1) * L, :],
                          ((0, 0), (0, 0), (j, 0)))[:, :, :Tq]
    y = jnp.tanh(oa.transpose(0, 2, 1).reshape(B, Tq * L))[:, None, :]   # [B, 1, T+mod]
    if mod != 0:
        y = y[:, :, :-mod]
    return {"x": y}


# ----------------------------- main --------------------------------------------
if __name__ == "__main__":
    key = jax.random.PRNGKey(0)
    k_par, k_mix, k_pit = jax.random.split(key, 3)

    B, T = 2, 64
    params = init_params(k_par)
    mixture = jax.random.normal(k_mix, (B, 1, T), jnp.float32)
    label = jax.nn.one_hot(jnp.array([3, 7]), LABEL_LEN, dtype=jnp.float32)   # [B, label_len]
    pitch_info = jax.random.uniform(k_pit, (B, 32), jnp.float32,
                                    minval=0.0, maxval=7500.0)

    fwd = jax.jit(net_forward)
    out = fwd(params, mixture, label, pitch_info)
    jax.block_until_ready(out["x"])
    assert out["x"].shape == (B, 1, T), out["x"].shape
    print("KERNEL_OK")
</pallas_src>

<mosaic_0001>
module attributes {stable_mosaic.version = 11 : i64} {
  func.func @_encoder_kernel(%arg0: i32, %arg1: memref<1x8x10xf32, #tpu.memory_space<vmem>>, %arg2: memref<3x32x8xbf16, #tpu.memory_space<vmem>>, %arg3: memref<1x32x8xf32, #tpu.memory_space<vmem>>) attributes {dimension_semantics = [#tpu.dimension_semantics<parallel>], iteration_bounds = array<i64: 2>, scalar_prefetch = 0 : i64, scratch_operands = 0 : i64, tpu.core_type = #tpu.core_type<tc>, window_params = [{transform_indices = @transform_0, window_bounds = array<i64: 1, 8, 10>}, {pipeline_mode = #tpu.pipeline_mode<synchronous>, transform_indices = @transform_1, window_bounds = array<i64: 3, 32, 8>}, {transform_indices = @transform_2, window_bounds = array<i64: 1, 32, 8>}]} {
    %c0 = arith.constant 0 : index
    %c0_0 = arith.constant 0 : index
    %c0_1 = arith.constant 0 : index
    %0 = vector.load %arg1[%c0, %c0_0, %c0_1] : memref<1x8x10xf32, #tpu.memory_space<vmem>>, vector<1x8x10xf32>
    %1 = vector.shape_cast %0 : vector<1x8x10xf32> to vector<8x10xf32>
    %2 = arith.truncf %1 : vector<8x10xf32> to vector<8x10xbf16>
    %cst = arith.constant 0.000000e+00 : f32
    %3 = vector.broadcast %cst : f32 to vector<32x8xf32>
    %c0_2 = arith.constant 0 : index
    %c0_3 = arith.constant 0 : index
    %c0_4 = arith.constant 0 : index
    %4 = vector.load %arg2[%c0_2, %c0_3, %c0_4] : memref<3x32x8xbf16, #tpu.memory_space<vmem>>, vector<1x32x8xbf16>
    %5 = vector.shape_cast %4 : vector<1x32x8xbf16> to vector<32x8xbf16>
    %6 = vector.extract_strided_slice %2 {offsets = [0, 0], sizes = [8, 8], strides = [1, 1]} : vector<8x10xbf16> to vector<8x8xbf16>
    %cst_5 = arith.constant dense<0.000000e+00> : vector<32x8xf32>
    %7 = tpu.matmul %5, %6, %cst_5 {dimension_numbers = #tpu.dot_dimension_numbers<[1], [0], [0], [1], [0, 0, 1, 1], [], []>} : vector<32x8xbf16>, vector<8x8xbf16>, vector<32x8xf32> -> vector<32x8xf32>
    %8 = arith.addf %3, %7 : vector<32x8xf32>
    %c1 = arith.constant 1 : index
    %c0_6 = arith.constant 0 : index
    %c0_7 = arith.constant 0 : index
    %9 = vector.load %arg2[%c1, %c0_6, %c0_7] : memref<3x32x8xbf16, #tpu.memory_space<vmem>>, vector<1x32x8xbf16>
    %10 = vector.shape_cast %9 : vector<1x32x8xbf16> to vector<32x8xbf16>
    %11 = vector.extract_strided_slice %2 {offsets = [0, 1], sizes = [8, 8], strides = [1, 1]} : vector<8x10xbf16> to vector<8x8xbf16>
    %cst_8 = arith.constant dense<0.000000e+00> : vector<32x8xf32>
    %12 = tpu.matmul %10, %11, %cst_8 {dimension_numbers = #tpu.dot_dimension_numbers<[1], [0], [0], [1], [0, 0, 1, 1], [], []>} : vector<32x8xbf16>, vector<8x8xbf16>, vector<32x8xf32> -> vector<32x8xf32>
    %13 = arith.addf %8, %12 : vector<32x8xf32>
    %c2 = arith.constant 2 : index
    %c0_9 = arith.constant 0 : index
    %c0_10 = arith.constant 0 : index
    %14 = vector.load %arg2[%c2, %c0_9, %c0_10] : memref<3x32x8xbf16, #tpu.memory_space<vmem>>, vector<1x32x8xbf16>
    %15 = vector.shape_cast %14 : vector<1x32x8xbf16> to vector<32x8xbf16>
    %16 = vector.extract_strided_slice %2 {offsets = [0, 2], sizes = [8, 8], strides = [1, 1]} : vector<8x10xbf16> to vector<8x8xbf16>
    %cst_11 = arith.constant dense<0.000000e+00> : vector<32x8xf32>
    %17 = tpu.matmul %15, %16, %cst_11 {dimension_numbers = #tpu.dot_dimension_numbers<[1], [0], [0], [1], [0, 0, 1, 1], [], []>} : vector<32x8xbf16>, vector<8x8xbf16>, vector<32x8xf32> -> vector<32x8xf32>
    %18 = arith.addf %13, %17 : vector<32x8xf32>
    %cst_12 = arith.constant 0.000000e+00 : f32
    %19 = vector.broadcast %cst_12 : f32 to vector<32x8xf32>
    %20 = arith.maximumf %18, %19 : vector<32x8xf32>
    %c0_13 = arith.constant 0 : index
    %c0_14 = arith.constant 0 : index
    %c0_15 = arith.constant 0 : index
    %21 = vector.load %arg3[%c0_13, %c0_14, %c0_15] : memref<1x32x8xf32, #tpu.memory_space<vmem>>, vector<1x32x8xf32>
    %22 = vector.shape_cast %21 : vector<1x32x8xf32> to vector<32x8xf32>
    %23 = vector.shape_cast %20 : vector<32x8xf32> to vector<1x32x8xf32>
    tpu.vector_store %arg3[%c0_13, %c0_14, %c0_15], %23 {strides = array<i32>} : memref<1x32x8xf32, #tpu.memory_space<vmem>>, vector<1x32x8xf32>,
    return
  }
  func.func @transform_0(%arg0: i32) -> (i32, i32, i32) {
    %c0_i32 = arith.constant 0 : i32
    %c0_i32_0 = arith.constant 0 : i32
    %c0_i32_1 = arith.constant 0 : i32
    return %arg0, %c0_i32, %c0_i32_0 : i32, i32, i32
  }
  func.func @transform_1(%arg0: i32) -> (i32, i32, i32) {
    %c0_i32 = arith.constant 0 : i32
    %c0_i32_0 = arith.constant 0 : i32
    %c0_i32_1 = arith.constant 0 : i32
    %c0_i32_2 = arith.constant 0 : i32
    return %c0_i32, %c0_i32_0, %c0_i32_1 : i32, i32, i32
  }
  func.func @transform_2(%arg0: i32) -> (i32, i32, i32) {
    %c0_i32 = arith.constant 0 : i32
    %c0_i32_0 = arith.constant 0 : i32
    %c0_i32_1 = arith.constant 0 : i32
    return %arg0, %c0_i32, %c0_i32_0 : i32, i32, i32
  }
}

module attributes {stable_mosaic.version = 11 : i64} {
  func.func @_fused_gn_bn_dec_kernel(%arg0: i32, %arg1: i32, %arg2: memref<1x48x2xf32, #tpu.memory_space<vmem>>, %arg3: memref<1x32x8xf32, #tpu.memory_space<vmem>>, %arg4: memref<1x1x8xi32, #tpu.memory_space<vmem>>, %arg5: memref<32x32xbf16, #tpu.memory_space<vmem>>, %arg6: memref<32x16xbf16, #tpu.memory_space<vmem>>, %arg7: memref<32x1xf32, #tpu.memory_space<vmem>>, %arg8: memref<24x32xbf16, #tpu.memory_space<vmem>>, %arg9: memref<1x24x8xf32, #tpu.memory_space<vmem>>) attributes {dimension_semantics = [#tpu.dimension_semantics<parallel>, #tpu.dimension_semantics<arbitrary>], iteration_bounds = array<i64: 2, 1>, scalar_prefetch = 0 : i64, scratch_operands = 0 : i64, tpu.core_type = #tpu.core_type<tc>, window_params = [{transform_indices = @transform_0, window_bounds = array<i64: 1, 48, 2>}, {transform_indices = @transform_1, window_bounds = array<i64: 1, 32, 8>}, {transform_indices = @transform_2, window_bounds = array<i64: 1, 1, 8>}, {pipeline_mode = #tpu.pipeline_mode<synchronous>, transform_indices = @transform_3, window_bounds = array<i64: 32, 32>}, {pipeline_mode = #tpu.pipeline_mode<synchronous>, transform_indices = @transform_4, window_bounds = array<i64: 32, 16>}, {pipeline_mode = #tpu.pipeline_mode<synchronous>, transform_indices = @transform_5, window_bounds = array<i64: 32, 1>}, {pipeline_mode = #tpu.pipeline_mode<synchronous>, transform_indices = @transform_6, window_bounds = array<i64: 24, 32>}, {transform_indices = @transform_7, window_bounds = array<i64: 1, 24, 8>}]} {
    %c0 = arith.constant 0 : index
    %c0_0 = arith.constant 0 : index
    %c0_1 = arith.constant 0 : index
    %0 = vector.load %arg2[%c0, %c0_0, %c0_1] : memref<1x48x2xf32, #tpu.memory_space<vmem>>, vector<1x48x2xf32>
    %1 = vector.shape_cast %0 : vector<1x48x2xf32> to vector<48x2xf32>
    %2 = vector.extract_strided_slice %1 {offsets = [0, 0], sizes = [48, 1], strides = [1, 1]} : vector<48x2xf32> to vector<48x1xf32>
    %3 = vector.extract_strided_slice %1 {offsets = [0, 1], sizes = [48, 1], strides = [1, 1]} : vector<48x2xf32> to vector<48x1xf32>
    %c0_2 = arith.constant 0 : index
    %c0_3 = arith.constant 0 : index
    %c0_4 = arith.constant 0 : index
    %4 = vector.load %arg3[%c0_2, %c0_3, %c0_4] : memref<1x32x8xf32, #tpu.memory_space<vmem>>, vector<1x32x8xf32>
    %5 = vector.shape_cast %4 : vector<1x32x8xf32> to vector<32x8xf32>
    %6 = vector.extract_strided_slice %2 {offsets = [0, 0], sizes = [32, 1], strides = [1, 1]} : vector<48x1xf32> to vector<32x1xf32>
    %7 = vector.broadcast %6 : vector<32x1xf32> to vector<32x8xf32>
    %8 = arith.mulf %5, %7 : vector<32x8xf32>
    %9 = vector.extract_strided_slice %3 {offsets = [0, 0], sizes = [32, 1], strides = [1, 1]} : vector<48x1xf32> to vector<32x1xf32>
    %10 = vector.broadcast %9 : vector<32x1xf32> to vector<32x8xf32>
    %11 = arith.addf %8, %10 : vector<32x8xf32>
    %12 = tpu.iota {dimensions = array<i32: 0>} : vector<16x8xi32>
    %c0_5 = arith.constant 0 : index
    %c0_6 = arith.constant 0 : index
    %c0_7 = arith.constant 0 : index
    %13 = vector.load %arg4[%c0_5, %c0_6, %c0_7] : memref<1x1x8xi32, #tpu.memory_space<vmem>>, vector<1x1x8xi32>
    %14 = vector.shape_cast %13 : vector<1x1x8xi32> to vector<1x8xi32>
    %15 = vector.broadcast %14 : vector<1x8xi32> to vector<16x8xi32>
    %16 = arith.cmpi eq, %12, %15 : vector<16x8xi32>
    %17 = arith.extui %16 : vector<16x8xi1> to vector<16x8xi32>
    %18 = arith.sitofp %17 : vector<16x8xi32> to vector<16x8xf32>
    %19 = vector.extract_strided_slice %2 {offsets = [32, 0], sizes = [16, 1], strides = [1, 1]} : vector<48x1xf32> to vector<16x1xf32>
    %20 = vector.broadcast %19 : vector<16x1xf32> to vector<16x8xf32>
    %21 = arith.mulf %18, %20 : vector<16x8xf32>
    %22 = vector.extract_strided_slice %3 {offsets = [32, 0], sizes = [16, 1], strides = [1, 1]} : vector<48x1xf32> to vector<16x1xf32>
    %23 = vector.broadcast %22 : vector<16x1xf32> to vector<16x8xf32>
    %24 = arith.addf %21, %23 : vector<16x8xf32>
    %c0_8 = arith.constant 0 : index
    %c0_9 = arith.constant 0 : index
    %25 = vector.load %arg5[%c0_8, %c0_9] : memref<32x32xbf16, #tpu.memory_space<vmem>>, vector<32x32xbf16>
    %26 = arith.truncf %11 : vector<32x8xf32> to vector<32x8xbf16>
    %cst = arith.constant dense<0.000000e+00> : vector<32x8xf32>
    %27 = tpu.matmul %25, %26, %cst {dimension_numbers = #tpu.dot_dimension_numbers<[1], [0], [0], [1], [0, 0, 1, 1], [], []>} : vector<32x32xbf16>, vector<32x8xbf16>, vector<32x8xf32> -> vector<32x8xf32>
    %c0_10 = arith.constant 0 : index
    %c0_11 = arith.constant 0 : index
    %28 = vector.load %arg6[%c0_10, %c0_11] : memref<32x16xbf16, #tpu.memory_space<vmem>>, vector<32x16xbf16>
    %29 = arith.truncf %24 : vector<16x8xf32> to vector<16x8xbf16>
    %cst_12 = arith.constant dense<0.000000e+00> : vector<32x8xf32>
    %30 = tpu.matmul %28, %29, %cst_12 {dimension_numbers = #tpu.dot_dimension_numbers<[1], [0], [0], [1], [0, 0, 1, 1], [], []>} : vector<32x16xbf16>, vector<16x8xbf16>, vector<32x8xf32> -> vector<32x8xf32>
    %31 = arith.addf %27, %30 : vector<32x8xf32>
    %c0_13 = arith.constant 0 : index
    %c0_14 = arith.constant 0 : index
    %32 = vector.load %arg7[%c0_13, %c0_14] : memref<32x1xf32, #tpu.memory_space<vmem>>, vector<32x1xf32>
    %33 = vector.broadcast %32 : vector<32x1xf32> to vector<32x8xf32>
    %34 = arith.addf %31, %33 : vector<32x8xf32>
    %c0_15 = arith.constant 0 : index
    %c0_16 = arith.constant 0 : index
    %35 = vector.load %arg8[%c0_15, %c0_16] : memref<24x32xbf16, #tpu.memory_space<vmem>>, vector<24x32xbf16>
    %36 = arith.truncf %34 : vector<32x8xf32> to vector<32x8xbf16>
    %cst_17 = arith.constant dense<0.000000e+00> : vector<24x8xf32>
    %37 = tpu.matmul %35, %36, %cst_17 {dimension_numbers = #tpu.dot_dimension_numbers<[1], [0], [0], [1], [0, 0, 1, 1], [], []>} : vector<24x32xbf16>, vector<32x8xbf16>, vector<24x8xf32> -> vector<24x8xf32>
    %c0_18 = arith.constant 0 : index
    %c0_19 = arith.constant 0 : index
    %c0_20 = arith.constant 0 : index
    %38 = vector.load %arg9[%c0_18, %c0_19, %c0_20] : memref<1x24x8xf32, #tpu.memory_space<vmem>>, vector<1x24x8xf32>
    %39 = vector.shape_cast %38 : vector<1x24x8xf32> to vector<24x8xf32>
    %40 = vector.shape_cast %37 : vector<24x8xf32> to vector<1x24x8xf32>
    tpu.vector_store %arg9[%c0_18, %c0_19, %c0_20], %40 {strides = array<i32>} : memref<1x24x8xf32, #tpu.memory_space<vmem>>, vector<1x24x8xf32>,
    return
  }
  func.func @transform_0(%arg0: i32, %arg1: i32) -> (i32, i32, i32) {
    %c0_i32 = arith.constant 0 : i32
    %c0_i32_0 = arith.constant 0 : i32
    %c0_i32_1 = arith.constant 0 : i32
    return %arg0, %c0_i32, %c0_i32_0 : i32, i32, i32
  }
  func.func @transform_1(%arg0: i32, %arg1: i32) -> (i32, i32, i32) {
    %c0_i32 = arith.constant 0 : i32
    %c0_i32_0 = arith.constant 0 : i32
    return %arg0, %c0_i32, %arg1 : i32, i32, i32
  }
  func.func @transform_2(%arg0: i32, %arg1: i32) -> (i32, i32, i32) {
    %c0_i32 = arith.constant 0 : i32
    %c0_i32_0 = arith.constant 0 : i32
    return %arg0, %c0_i32, %arg1 : i32, i32, i32
  }
  func.func @transform_3(%arg0: i32, %arg1: i32) -> (i32, i32) {
    %c0_i32 = arith.constant 0 : i32
    %c0_i32_0 = arith.constant 0 : i32
    %c0_i32_1 = arith.constant 0 : i32
    return %c0_i32, %c0_i32_0 : i32, i32
  }
  func.func @transform_4(%arg0: i32, %arg1: i32) -> (i32, i32) {
    %c0_i32 = arith.constant 0 : i32
    %c0_i32_0 = arith.constant 0 : i32
    %c0_i32_1 = arith.constant 0 : i32
    return %c0_i32, %c0_i32_0 : i32, i32
  }
  func.func @transform_5(%arg0: i32, %arg1: i32) -> (i32, i32) {
    %c0_i32 = arith.constant 0 : i32
    %c0_i32_0 = arith.constant 0 : i32
    %c0_i32_1 = arith.constant 0 : i32
    return %c0_i32, %c0_i32_0 : i32, i32
  }
  func.func @transform_6(%arg0: i32, %arg1: i32) -> (i32, i32) {
    %c0_i32 = arith.constant 0 : i32
    %c0_i32_0 = arith.constant 0 : i32
    %c0_i32_1 = arith.constant 0 : i32
    return %c0_i32, %c0_i32_0 : i32, i32
  }
  func.func @transform_7(%arg0: i32, %arg1: i32) -> (i32, i32, i32) {
    %c0_i32 = arith.constant 0 : i32
    %c0_i32_0 = arith.constant 0 : i32
    return %arg0, %c0_i32, %arg1 : i32, i32, i32
  }
}

</mosaic_0001>

<bundles_post_ra>
// kernel: squeeze.1
= control target key start
LH: loop header
LB: loop body
LE: loop exit
PB: predicated region body
PF: predicated region fallthrough
CT: control target
= control target key end

     0   :  { %s83_s8 = smov 104   ;;  %vm8_vm0 = vcmask 64512   ;;  %s84_s11 = smov 112   ;;  %s144_s0 = inlined_call_operand.vmem [shape: f32[2,80], index: 0, kind: input, shape index: {}]   ;;  %s145_s1 = inlined_call_operand.vmem [shape: f32[2,10,8], index: 1, kind: output, shape index: {}]  }
   0x1   :  { %v5_v0 = vld [vmem:[%s144_s0] sm:$0x3]  ;;  %s82_s0 = smov 120   ;;  %s85_s12 = smov 96  }
   0x2   :  { %6 = vst [vmem:[#allocation0] sm:$0x3] %v5_v0  ;;  %s86_s13 = smov 88   ;;  %s87_s14 = smov 80  }
   0x3   :  { %s88_s15 = smov 72   ;;  %s89_s16 = smov 64  }
   0x4   :  { %s90_s17 = smov 56  }
   0x9   :  { %v10_v1 = vld [vmem:[#allocation0] sm:$0x3]  }
   0xa   :  { %v22_v2 = vld [vmem:[#allocation0] sm:$0x3]   ;;  %11 = vrot.lane.b32.xlu0 %v10_v1, %s82_s0 }
   0xb   :  { %23 = vrot.lane.b32.xlu1 %v22_v2, %s83_s8  ;;  %v16_v3 = vld [vmem:[#allocation0] sm:$0x3]  }
   0xc   :  { %v28_v4 = vld [vmem:[#allocation0] sm:$0x3]  }
   0xd   :  { %v7_v5 = vld [vmem:[#allocation0] sm:$0x3]  }
   0xe   :  { %9 = vst.msk [vmem:[%s145_s1] ss:$16 sm:$0x3] %vm8_vm0, %v7_v5   ;;  %17 = vrot.lane.b32.xlu0 %v16_v3, %s84_s11  ;;  %v34_v6 = vld [vmem:[#allocation0] sm:$0x3]  }
   0xf   :  { %29 = vrot.lane.b32.xlu1 %v28_v4, %s85_s12  ;;  %v40_v7 = vld [vmem:[#allocation0] sm:$0x3]  }
  0x10   :  { %v46_v8 = vld [vmem:[#allocation0] sm:$0x3]  }
  0x11   :  { %v52_v9 = vld [vmem:[#allocation0] sm:$0x3]  }
  0x12   :  { %35 = vrot.lane.b32.xlu0 %v34_v6, %s86_s13  ;;  %v58_v10 = vld [vmem:[#allocation0] sm:$0x3]  }
  0x13   :  { %41 = vrot.lane.b32.xlu1 %v40_v7, %s87_s14 }
  0x16   :  { %47 = vrot.lane.b32.xlu0 %v46_v8, %s88_s15 }
  0x17   :  { %53 = vrot.lane.b32.xlu1 %v52_v9, %s89_s16 }
  0x1a   :  { %59 = vrot.lane.b32.xlu0 %v58_v10, %s90_s17 }
  0x7c   :  { %v12_v11 = vpop.permute.xlu0 %11  }
  0x7d   :  { %v24_v12 = vpop.permute.xlu1 %23   ;;  %64 = vst.msk [vmem:[%s145_s1 + $0x1] ss:$16 sm:$0x3] %vm8_vm0, %v12_v11  }
  0x7e   :  { %66 = vst.msk [vmem:[%s145_s1 + $0x3] ss:$16 sm:$0x3] %vm8_vm0, %v24_v12  }
  0x80   :  { %v18_v13 = vpop.permute.xlu0 %17  }
  0x81   :  { %v30_v14 = vpop.permute.xlu1 %29   ;;  %65 = vst.msk [vmem:[%s145_s1 + $0x2] ss:$16 sm:$0x3] %vm8_vm0, %v18_v13  }
  0x82   :  { %67 = vst.msk [vmem:[%s145_s1 + $0x4] ss:$16 sm:$0x3] %vm8_vm0, %v30_v14  }
  0x84   :  { %v36_v15 = vpop.permute.xlu0 %35  }
  0x85   :  { %v42_v16 = vpop.permute.xlu1 %41   ;;  %68 = vst.msk [vmem:[%s145_s1 + $0x5] ss:$16 sm:$0x3] %vm8_vm0, %v36_v15  }
  0x86   :  { %69 = vst.msk [vmem:[%s145_s1 + $0x6] ss:$16 sm:$0x3] %vm8_vm0, %v42_v16  }
  0x88   :  { %v48_v17 = vpop.permute.xlu0 %47  }
  0x89   :  { %v54_v18 = vpop.permute.xlu1 %53   ;;  %70 = vst.msk [vmem:[%s145_s1 + $0x7] ss:$16 sm:$0x3] %vm8_vm0, %v48_v17  }
  0x8a   :  { %71 = vst.msk [vmem:[%s145_s1 + $0x8] ss:$16 sm:$0x3] %vm8_vm0, %v54_v18  }
  0x8c   :  { %v60_v19 = vpop.permute.xlu0 %59  }
  0x8d   :  { %72 = vst.msk [vmem:[%s145_s1 + $0x9] ss:$16 sm:$0x3] %vm8_vm0, %v60_v19  }

// kernel: net_forward.3
= control target key start
LH: loop header
LB: loop body
LE: loop exit
PB: predicated region body
PF: predicated region fallthrough
CT: control target
= control target key end

     0   :  { %s964_s24 = smov 0   ;;  %s966_s25 = smov 0   ;;  %s1045_s0 = inlined_call_operand.vmem [shape: f32[2,48,2], index: 0, kind: input, shape index: {}]   ;;  %s1046_s1 = inlined_call_operand.vmem [shape: f32[2,32,8], index: 1, kind: input, shape index: {}]   ;;  %s1047_s2 = inlined_call_operand.vmem [shape: s32[2,1,8], index: 2, kind: input, shape index: {}]   ;;  %s1048_s3 = inlined_call_operand.vmem [shape: bf16[32,32], index: 3, kind: input, shape index: {}]   ;;  %s1049_s4 = inlined_call_operand.vmem [shape: bf16[32,16], index: 4, kind: input, shape index: {}]   ;;  %s1050_s5 = inlined_call_operand.vmem [shape: f32[32,1], index: 5, kind: input, shape index: {}]   ;;  %s1051_s6 = inlined_call_operand.vmem [shape: bf16[24,32], index: 6, kind: input, shape index: {}]   ;;  %s1052_s7 = inlined_call_operand.vmem [shape: f32[2,24,8], index: 7, kind: output, shape index: {}]  }
   0x1   :  { %s968_s26 = smov 0  }
   0x2 LB: > { %s29_s27 = sadd.s32 1, %s915_s25  ;;  %p799_p0 = scmp.ge.s32.totalorder %s919_s26, 1  ;;  %s919_s26 = sphi %s968_s26, %s17_s26   ;;  %s915_s25 = sphi %s966_s25, %s1054_s25   ;;  %s911_s24 = sphi %s964_s24, %s1053_s24  }
   0x3   : > { %p31_p1 = scmp.ge.s32.totalorder %s29_s27, 2  ;;  %p279_p2 = scmp.lt.s32.totalorder %s919_s26, 3 }
   0x5   : > { %s1056_s27 = smov (%p31_p1, %s29_s27), 0  ;;  %p280_p3 = pnand %p799_p0, %p279_p2 }
   0x6   : > { %p328_p4 = scmp.lt.s32.totalorder (!%p280_p3), %s911_s24, 1 }
   0x7   : > { %283 = sbr.rel (%p280_p3) target bundleno = 582 (0x246), region = 48 }
   0xc   : > { %v921_v0 = vmov 1   ;;  %v922_v1 = vmov 0   ;;  %s1058_s24 = smov (!%p328_p4, %s911_s24), 1  ;;  %v891_v8 = vld [vmem:[%s1048_s3] sm:$0xff]   ;;  %vm533_vm0 = vcmask 261120   ;;  %vm467_vm1 = vcmask 130048  }
   0xd   : > { %885 = vset.pattern.permute.xlu1 %v921_v0  ;;  %884 = vset.pattern.permute.xlu0 %v922_v1  ;;  %s855_s28 = smul.u32 48, %s1058_s24  ;;  %v893_v9 = vld [vmem:[%s1049_s4] sm:$0xff]   ;;  %v591_v10 = vld [vmem:[%s1050_s5 + $0x10] sm:$0xff]  ;;  %v592_v11 = vld [vmem:[%s1050_s5 + $0x18] sm:$0xff]  ;;  %s821_s21 = sshll.u32 %s1058_s24, 5  ;;  %v410_v18 = vlaneseq  ;;  %v923_v37 = vmov 0.0  }
   0xe   : > { %843 = vmatprep.mubr.msk.bf16.mxu1 %vm533_vm0, %v891_v8  ;;  %835 = vmatprep.mubr.msk.bf16.mxu0 %vm467_vm1, %v893_v9  ;;  %v589_v12 = vld [vmem:[%s1050_s5] sm:$0xff]  ;;  %v590_v13 = vld [vmem:[%s1050_s5 + $0x8] sm:$0xff]  ;;  %s856_s17 = smul.u32 24, %s1058_s24  ;;  %vm684_vm4 = vcmask 64512  }
   0xf   : > { %s332_s8 = scalar_lea.vmem %s1045_s0, %s855_s28  ;;  %s340_s28 = scalar_lea.vmem %s1046_s1, %s821_s21  ;;  %v411_v23 = vshrl.u32 %v410_v18, 7  ;;  %v892_v51 = vld [vmem:[%s1048_s3 + $0x8] sm:$0xff]   ;;  %v895_v54 = vld [vmem:[%s1051_s6] sm:$0xff]  }
  0x10   : > { %v358_v2 = vld [vmem:[%s332_s8 + $0x10] sm:$0xff]  ;;  %v359_v3 = vld [vmem:[%s332_s8 + $0x18] sm:$0xff]  ;;  %v356_v4 = vld [vmem:[%s332_s8] sm:$0xff]  ;;  %s354_s20 = scalar_lea.vmem %s1052_s7, %s856_s17 }
  0x11   : > { %399 = vperm.xlu1 %885, %v358_v2   ;;  %378 = vperm.xlu0 %884, %v358_v2   ;;  %v357_v5 = vld [vmem:[%s332_s8 + $0x8] sm:$0xff]  ;;  %v360_v6 = vld [vmem:[%s332_s8 + $0x20] sm:$0xff]  ;;  %v364_v15 = vld [vmem:[%s340_s28 + $0x10] sm:$0xff]  ;;  %v412_v29 = vadd.s32 8, %v411_v23 }
  0x12   : > { %v361_v7 = vld [vmem:[%s332_s8 + $0x28] sm:$0xff]  ;;  %v365_v17 = vld [vmem:[%s340_s28 + $0x18] sm:$0xff]  ;;  %s346_s8 = scalar_lea.vmem %s1047_s2, %s1058_s24  ;;  %v362_v32 = vld [vmem:[%s340_s28] sm:$0xff] }
  0x13   : > { %v804_v30 = vld [vmem:[%s346_s8] ss:$0 sm:$0xff]  ;;  %v363_v34 = vld [vmem:[%s340_s28 + $0x8] sm:$0xff] }
  0x14   : > { %vm419_vm2 = vcmp.eq.s32.totalorder %v412_v29, %v804_v30  ;;  %vm418_vm3 = vcmp.eq.s32.totalorder %v411_v23, %v804_v30  ;;  %v894_v53 = vld [vmem:[%s1049_s4 + $0x8] sm:$0xff]  }
  0x15   : > { %403 = vperm.xlu1 %885, %v359_v3   ;;  %383 = vperm.xlu0 %884, %v359_v3   ;;  %v806_v38 = vsel %vm419_vm2, 1.0, %v923_v37  ;;  %v805_v40 = vsel %vm418_vm3, 1.0, %v923_v37 }
  0x19   : > { %886 = vset.pattern.permute.xlu1 %v922_v1  ;;  %368 = vperm.xlu0 %884, %v356_v4  }
  0x1a   : > { %373 = vperm.xlu1 %886, %v357_v5  }
  0x1d   : > { %426 = vperm.xlu0 %884, %v360_v6  }
  0x1e   : > { %431 = vperm.xlu1 %886, %v361_v7  }
  0x21   : > { %887 = vset.pattern.permute.xlu0 %v921_v0 }
  0x22   : > { %888 = vset.pattern.permute.xlu1 %v921_v0  ;;  %391 = vperm.xlu0 %887, %v356_v4  }
  0x23   : > { %395 = vperm.xlu1 %888, %v357_v5  }
  0x26   : > { %441 = vperm.xlu0 %887, %v361_v7  }
  0x27   : > { %437 = vperm.xlu1 %888, %v360_v6  }
  0x2a   : > { %890 = vset.pattern.permute.xlu0 %v922_v1 }
  0x2b   : > { %889 = vset.pattern.permute.xlu1 %v922_v1  ;;  %610 = vperm.xlu0 %890, %v592_v11  }
  0x2c   : > { %605 = vperm.xlu1 %889, %v591_v10  }
  0x30   : > { %595 = vperm.xlu1 %889, %v589_v12  }
  0x34   : > { %600 = vperm.xlu1 %889, %v590_v13   ;;  %v896_v13 = vld [vmem:[%s1051_s6 + $0x8] ss:$0 sps:$4 sm:$0xff]  }
  0x8c   : > { %v400_v14 = vpop.permute.xlu1 %399  ;;  %v379_v16 = vpop.permute.xlu0 %378 }
  0x8d   : > { %v388_v19 = vmul.f32 %v379_v16, %v364_v15 }
  0x8f   : > { %v408_v24 = vadd.f32 %v400_v14, %v388_v19 }
  0x90   : > { %v404_v20 = vpop.permute.xlu1 %403  ;;  %v384_v21 = vpop.permute.xlu0 %383 }
  0x91   : > { %v389_v22 = vmul.f32 %v384_v21, %v365_v17 }
  0x93   : > { %v409_v25 = vadd.f32 %v404_v20, %v389_v22 }
  0x94   : > { %v369_v26 = vpop.permute.xlu0 %368 }
  0x95   : > { %v374_v27 = vpop.permute.xlu1 %373  ;;  %v451_v28 = vpack.c.bf16 %v409_v25, %v408_v24  ;;  %v386_v35 = vmul.f32 %v369_v26, %v362_v32 }
  0x96   : > { %v387_v36 = vmul.f32 %v374_v27, %v363_v34 }
  0x97   : > { %839 = vmatprep.subr.bf16.mxu1 %v451_v28 }
  0x98   : > { %840 = vmatpush3.bf16.msra.mxu1 %v451_v28  ;;  %v427_v31 = vpop.permute.xlu0 %426 }
  0x99   : > { %v432_v33 = vpop.permute.xlu1 %431  ;;  %v434_v45 = vmul.f32 %v805_v40, %v427_v31 }
  0x9a   : > { %v435_v44 = vmul.f32 %v806_v38, %v432_v33 }
  0x9d   : > { %v392_v39 = vpop.permute.xlu0 %391 }
  0x9e   : > { %v406_v41 = vadd.f32 %v392_v39, %v386_v35  ;;  %v396_v42 = vpop.permute.xlu1 %395 }
  0x9f   : > { %v407_v43 = vadd.f32 %v396_v42, %v387_v36 }
  0xa1   : > { %v450_v46 = vpack.c.bf16 %v407_v43, %v406_v41  ;;  %v442_v47 = vpop.permute.xlu0 %441 }
  0xa2   : > { %v445_v48 = vadd.f32 %v442_v47, %v435_v44  ;;  %v438_v49 = vpop.permute.xlu1 %437 }
  0xa3   : > { %v444_v50 = vadd.f32 %v438_v49, %v434_v45  ;;  %841 = vmatprep.subr.bf16.mxu1 %v450_v46 }
  0xa4   : > { %842 = vmatpush3.bf16.msra.mxu1 %v450_v46 }
  0xa5   : > { %v456_v52 = vpack.c.bf16 %v445_v48, %v444_v50 }
  0xa6   : > { %v611_v0 = vpop.permute.xlu0 %610 }
  0xa7   : > { %833 = vmatprep.subr.bf16.mxu0 %v456_v52  ;;  %844 = vmatmul.mubr.msk.bf16.vlgmr.msra.gmra.mxu1 %vm533_vm0, %v892_v51  ;;  %v606_v55 = vpop.permute.xlu1 %605 }
  0xa8   : > { %834 = vmatpush3.bf16.msra.mxu0 %v456_v52 }
  0xab   : > { %836 = vmatmul.mubr.msk.bf16.vlgmr.msra.gmra.mxu0 %vm467_vm1, %v894_v53  ;;  %v596_v59 = vpop.permute.xlu1 %595 }
  0xac   : > { %851 = vmatprep.mubr.msk.bf16.mxu0 %vm533_vm0, %v895_v54 }
  0xaf   : > { %v601_v8 = vpop.permute.xlu1 %600 }
 0x167   : > { %v845_v56 = vpop.f32.mrf.mxu1 }
 0x169   : > { %v574_v57 = vpop.f32.mrf.mxu1 }
 0x16b   : > { %v837_v58 = vpop.f32.mrf.mxu0  ;;  %v846_v60 = vpop.f32.mrf.mxu1 }
 0x16c   : > { %v583_v62 = vadd.f32 %v845_v56, %v837_v58 }
 0x16d   : > { %v508_v61 = vpop.f32.mrf.mxu0  ;;  %v577_v3 = vpop.f32.mrf.mxu1 }
 0x16e   : > { %v575_v1 = vadd.f32 %v574_v57, %v508_v61  ;;  %v615_v5 = vadd.f32 %v606_v55, %v583_v62 }
 0x16f   : > { %v838_v63 = vpop.f32.mrf.mxu0 }
 0x170   : > { %v586_v2 = vadd.f32 %v846_v60, %v838_v63  ;;  %v613_v9 = vadd.f32 %v596_v59, %v575_v1 }
 0x171   : > { %v511_v4 = vpop.f32.mrf.mxu0 }
 0x172   : > { %v578_v6 = vadd.f32 %v577_v3, %v511_v4  ;;  %v616_v7 = vadd.f32 %v611_v0, %v586_v2 }
 0x174   : > { %v614_v10 = vadd.f32 %v601_v8, %v578_v6  ;;  %v621_v11 = vpack.c.bf16 %v616_v7, %v615_v5 }
 0x176   : > { %847 = vmatprep.subr.bf16.mxu0 %v621_v11  ;;  %v620_v12 = vpack.c.bf16 %v614_v10, %v613_v9 }
 0x177   : > { %848 = vmatpush3.bf16.msra.mxu0 %v621_v11 }
 0x178   : > { %849 = vmatprep.subr.bf16.mxu0 %v620_v12 }
 0x17b   : > { %850 = vmatpush3.bf16.msra.mxu0 %v620_v12 }
 0x17e   : > { %852 = vmatmul.mubr.msk.bf16.vlgmr.msra.gmra.mxu0 %vm533_vm0, %v896_v13 }
 0x23e   : > { %v853_v14 = vpop.f32.mrf.mxu0 }
 0x23f   : > { %687 = vst.msk [vmem:[%s354_s20 + $0x10] sm:$0xff] %vm684_vm4, %v853_v14 }
 0x240   : > { %v670_v15 = vpop.f32.mrf.mxu0 }
 0x241   : > { %685 = vst.msk [vmem:[%s354_s20] sm:$0xff] %vm684_vm4, %v670_v15 }
 0x242   : > { %v854_v16 = vpop.f32.mrf.mxu0 }
 0x244   : > { %v673_v17 = vpop.f32.mrf.mxu0 }
 0x245   : > { %686 = vst.msk [vmem:[%s354_s20 + $0x8] sm:$0xff] %vm684_vm4, %v673_v17 }
 0x246 PF: > { %s17_s26 = sadd.s32 1, %s919_s26   ;;  %s1053_s24 = smov %s915_s25 }
 0x247   : > { %p14_p5 = scmp.ge.s32.totalorder %s17_s26, 4   ;;  %s1054_s25 = smov %s1056_s27 }
 0x249   :  { %16 = sbr.rel (!%p14_p5) target bundleno = 2 (0x2), region = 84 }

// kernel: net_forward.2
= control target key start
LH: loop header
LB: loop body
LE: loop exit
PB: predicated region body
PF: predicated region fallthrough
CT: control target
= control target key end

     0   :  { %s538_s9 = smov 0   ;;  %s593_s0 = inlined_call_operand.vmem [shape: f32[2,8,10], index: 0, kind: input, shape index: {}]   ;;  %s594_s1 = inlined_call_operand.vmem [shape: bf16[3,32,8], index: 1, kind: input, shape index: {}]   ;;  %s595_s2 = inlined_call_operand.vmem [shape: f32[2,32,8], index: 2, kind: output, shape index: {}]  }
   0x1 LB: > { %s436_s10 = sadd.s32 4294967295, %s519_s9   ;;  %p440_p0 = scmp.ge.s32.totalorder %s519_s9, 1  ;;  %s519_s9 = sphi %s538_s9, %s12_s9  }
   0x2   : > { %p111_p1 = scmp.lt.s32.totalorder %s519_s9, 3 }
   0x4   : > { %p112_p2 = pnand %p440_p0, %p111_p1 }
   0x5   : > { %p132_p3 = scmp.lt.s32.totalorder (!%p112_p2), %s436_s10, 1  ;;  %s521_s19 = smov (!%p112_p2), 127  }
   0x6   : > { %115 = sbr.rel (%p112_p2) target bundleno = 348 (0x15c), region = 28  ;;  %s522_s22 = smov (!%p112_p2), 126  }
   0xb   : > { %v507_v0 = vld [vmem:[%s594_s1 + $0x10] sm:$0xff]   ;;  %vm166_vm0 = vcmask 64512   ;;  %s597_s10 = smov (!%p132_p3, %s436_s10), 1  ;;  %v508_v1 = vld [vmem:[%s594_s1] sm:$0xff]   ;;  %vm173_vm1 = vcmask 1043456   ;;  %v510_v5 = vld [vmem:[%s594_s1 + $0x8] sm:$0xff]  }
   0xc   : > { %478 = vmatprep.mubr.msk.bf16.mxu0 %vm166_vm0, %v507_v0  ;;  %s441_s15 = sshll.u32 %s597_s10, 3  ;;  %484 = vmatprep.mubr.msk.bf16.mxu1 %vm166_vm0, %v508_v1  ;;  %v509_v8 = vld [vmem:[%s594_s1 + $0x18] sm:$0xff]   ;;  %v511_v9 = vld [vmem:[%s594_s1 + $0x20] sm:$0xff]   ;;  %v512_v12 = vld [vmem:[%s594_s1 + $0x28] sm:$0xff]   ;;  %s466_s29 = sshll.u32 %s597_s10, 5 }
   0xd   : > { %s135_s18 = scalar_lea.vmem %s593_s0, %s441_s15  ;;  %s140_s4 = scalar_lea.vmem %s595_s2, %s466_s29 }
   0xe   : > { %v142_v2 = vld [vmem:[%s135_s18] sm:$0xff] }
   0xf   : > { %v143_v3 = vpack.c.bf16 %v142_v2, %v142_v2 }
  0x11   : > { %164 = vrot.lane.b32.xlu0 %v143_v3, %s521_s19  ;;  %495 = vmatprep.subr.msk.bf16.mxu1 %vm173_vm1, %v143_v3  ;;  %v243_v4 = vsel %vm173_vm1, %v143_v3, 0 }
  0x12   : > { %483 = vmatpush3.bf16.msra.mxu1 %v243_v4 }
  0x15   : > { %309 = vrot.lane.b32.xlu0 %v143_v3, %s522_s22  ;;  %485 = vmatmul.mubr.msk.bf16.vlgmr.msra.gmra.mxu1 %vm166_vm0, %v510_v5 }
  0x83   : > { %v165_v6 = vpop.permute.xlu0 %164 }
  0x84   : > { %494 = vmatprep.subr.msk.bf16.mxu0 %vm173_vm1, %v165_v6  ;;  %v175_v7 = vsel %vm173_vm1, %v165_v6, 0 }
  0x85   : > { %477 = vmatpush3.bf16.msra.mxu0 %v175_v7 }
  0x87   : > { %v310_v10 = vpop.permute.xlu0 %309 }
  0x88   : > { %v318_v11 = vsel %vm173_vm1, %v310_v10, 0  ;;  %479 = vmatmul.mubr.msk.bf16.vlgmr.msra.gmra.mxu0 %vm166_vm0, %v509_v8  ;;  %496 = vmatprep.subr.msk.bf16.mxu0 %vm173_vm1, %v310_v10 }
  0x89   : > { %489 = vmatpush3.bf16.msra.mxu0 %v318_v11  ;;  %490 = vmatprep.mubr.msk.bf16.mxu0 %vm166_vm0, %v511_v9 }
  0x90   : > { %491 = vmatmul.mubr.msk.bf16.vlgmr.msra.gmra.mxu0 %vm166_vm0, %v512_v12 }
  0xd5   : > { %v486_v13 = vpop.f32.mrf.mxu1 }
  0xd7   : > { %v279_v16 = vpop.f32.mrf.mxu1 }
  0xd9   : > { %v487_v18 = vpop.f32.mrf.mxu1 }
  0xdb   : > { %v282_v24 = vpop.f32.mrf.mxu1 }
 0x148   : > { %v480_v14 = vpop.f32.mrf.mxu0 }
 0x149   : > { %v288_v20 = vadd.f32 %v486_v13, %v480_v14 }
 0x14a   : > { %v211_v15 = vpop.f32.mrf.mxu0 }
 0x14b   : > { %v280_v22 = vadd.f32 %v279_v16, %v211_v15 }
 0x14c   : > { %v481_v17 = vpop.f32.mrf.mxu0 }
 0x14d   : > { %v291_v26 = vadd.f32 %v487_v18, %v481_v17 }
 0x14e   : > { %v214_v19 = vpop.f32.mrf.mxu0 }
 0x14f   : > { %v283_v30 = vadd.f32 %v282_v24, %v214_v19 }
 0x150   : > { %v492_v21 = vpop.f32.mrf.mxu0 }
 0x151   : > { %v371_v23 = vadd.f32 %v492_v21, %v288_v20 }
 0x152   : > { %v354_v25 = vpop.f32.mrf.mxu0 }
 0x153   : > { %v375_v27 = vmax.f32 %v371_v23, 0.0  ;;  %v369_v28 = vadd.f32 %v354_v25, %v280_v22 }
 0x154   : > { %v493_v29 = vpop.f32.mrf.mxu0 }
 0x155   : > { %379 = vst.msk [vmem:[%s140_s4 + $0x10] sm:$0xff] %vm166_vm0, %v375_v27  ;;  %v373_v31 = vmax.f32 %v369_v28, 0.0  ;;  %v372_v32 = vadd.f32 %v493_v29, %v291_v26 }
 0x156   : > { %v357_v33 = vpop.f32.mrf.mxu0 }
 0x157   : > { %377 = vst.msk [vmem:[%s140_s4] sm:$0xff] %vm166_vm0, %v373_v31  ;;  %v376_v34 = vmax.f32 %v372_v32, 0.0  ;;  %v370_v35 = vadd.f32 %v357_v33, %v283_v30 }
 0x159   : > { %380 = vst.msk [vmem:[%s140_s4 + $0x18] sm:$0xff] %vm166_vm0, %v376_v34  ;;  %v374_v36 = vmax.f32 %v370_v35, 0.0 }
 0x15b   : > { %378 = vst.msk [vmem:[%s140_s4 + $0x8] sm:$0xff] %vm166_vm0, %v374_v36 }
 0x15c PF: > { %s12_s9 = sadd.s32 1, %s519_s9  }
 0x15d   : > { %p9_p4 = scmp.ge.s32.totalorder %s12_s9, 4  }
 0x15f   :  { %11 = sbr.rel (!%p9_p4) target bundleno = 1 (0x1), region = 60 }

</bundles_post_ra>
